<compile_context>
chip_gen: v7x
topology: tpu7x:2x2x1
jax: 0.10.0
libtpu: 0.0.40
codegen_flags: <defaults>
</compile_context>

<pallas_src>
import jax
import jax.numpy as jnp
from jax.experimental import pallas as pl
from jax.experimental.pallas import tpu as pltpu


def _round_up(x, m):
    return ((x + m - 1) // m) * m


def critic_kernel(
    x_ref,                      # [TB, S+A]   bf16   concat(state, action)
    w_in_ref, b_in_ref,         # [S+A, 64]   bf16 / [1, 64]  f32
    w_mid_ref, b_mid_ref,       # [64, 64]    bf16 / [1, 64]  f32
    w1_ref, b1_ref,             # [64, L]     bf16 / [1, L]   f32
    w2_ref, b2_ref,             # [L, L]      bf16 / [1, L]   f32
    w3_ref, b3_ref,             # [L, L]      bf16 / [1, L]   f32
    wq_ref, bq_ref,             # [L, 1]      bf16 / [1, 1]   f32
    out_ref,                    # [TB, 1]     f32
):
    relu = lambda t: jnp.maximum(t, 0.0)
    # bf16 operands on the MXU, f32 accumulation.
    bdot = lambda t, w_ref: jnp.dot(
        t.astype(jnp.bfloat16), w_ref[...], preferred_element_type=jnp.float32)

    h = x_ref[...]
    h = relu(bdot(h, w_in_ref) + b_in_ref[...])    # blockdiag(state_l1, action_l)
    h = relu(bdot(h, w_mid_ref) + b_mid_ref[...])  # blockdiag(state_l2, I) — relu idempotent
    h = relu(bdot(h, w1_ref) + b1_ref[...])        # fc1 over implicit concat
    h = relu(bdot(h, w2_ref) + b2_ref[...])        # fc2
    h = relu(bdot(h, w3_ref) + b3_ref[...])        # fc3
    out_ref[...] = bdot(h, wq_ref) + bq_ref[...]   # q_value head (no activation)


def _init_linear(key, fan_in, fan_out):
    """PyTorch-default-style uniform(-1/sqrt(fan_in), 1/sqrt(fan_in)) init.

    Returns weight as [in, out] (transposed vs. torch) and bias as [1, out].
    """
    kw, kb = jax.random.split(key)
    bound = 1.0 / jnp.sqrt(jnp.float32(fan_in))
    w = jax.random.uniform(kw, (fan_in, fan_out), jnp.float32, -bound, bound)
    b = jax.random.uniform(kb, (1, fan_out), jnp.float32, -bound, bound)
    return w, b


def make_critic_params(key, inputs_dim, layer_size=256):
    """Raw (un-fused, f32) parameters mirroring the PyTorch module."""
    state_dim, action_dim = inputs_dim
    keys = jax.random.split(key, 7)
    ws1, bs1 = _init_linear(keys[0], state_dim, 32)
    ws2, bs2 = _init_linear(keys[1], 32, 32)
    wa, ba = _init_linear(keys[2], action_dim, 32)
    w1, b1 = _init_linear(keys[3], 64, layer_size)
    w2, b2 = _init_linear(keys[4], layer_size, layer_size)
    w3, b3 = _init_linear(keys[5], layer_size, layer_size)
    wq, bq = _init_linear(keys[6], layer_size, 1)
    return dict(ws1=ws1, bs1=bs1, ws2=ws2, bs2=bs2, wa=wa, ba=ba,
                w1=w1, b1=b1, w2=w2, b2=b2, w3=w3, b3=b3, wq=wq, bq=bq)


def pack_critic_params(p):
    """Fuse the front-end into block-diagonal layers; weights -> bf16, biases f32."""
    S = p["ws1"].shape[0]
    A = p["wa"].shape[0]

    w_in = jnp.zeros((S + A, 64), jnp.float32)
    w_in = w_in.at[:S, :32].set(p["ws1"]).at[S:, 32:].set(p["wa"])
    b_in = jnp.concatenate([p["bs1"], p["ba"]], axis=1)

    w_mid = jnp.zeros((64, 64), jnp.float32)
    w_mid = w_mid.at[:32, :32].set(p["ws2"])
    w_mid = w_mid.at[32:, 32:].set(jnp.eye(32, dtype=jnp.float32))
    b_mid = jnp.concatenate([p["bs2"], jnp.zeros((1, 32), jnp.float32)], axis=1)

    bf = lambda w: w.astype(jnp.bfloat16)
    return dict(
        w_in=bf(w_in), b_in=b_in,
        w_mid=bf(w_mid), b_mid=b_mid,
        w1=bf(p["w1"]), b1=p["b1"],
        w2=bf(p["w2"]), b2=p["b2"],
        w3=bf(p["w3"]), b3=p["b3"],
        wq=bf(p["wq"]), bq=p["bq"],
    )


def critic_forward(state, action, packed, *, batch_tile=256):
    B = state.shape[0]
    L = packed["w2"].shape[0]

    # Concatenate state/action once in the wrapper (cheap) and stream in bf16.
    x = jnp.concatenate(
        [state.astype(jnp.float32), action.astype(jnp.float32)], axis=1
    ).astype(jnp.bfloat16)
    Din = x.shape[1]

    # Batch tile: multiple of 8 sublanes, capped at `batch_tile` rows
    # (sized well inside v7x's 64 MiB VMEM; weights ~0.3 MiB bf16).
    TB = min(batch_tile, _round_up(B, 8))
    Bp = _round_up(B, TB)
    if Bp != B:
        x = jnp.pad(x, ((0, Bp - B), (0, 0)))
    grid = (Bp // TB,)

    weights = (packed["w_in"], packed["b_in"],
               packed["w_mid"], packed["b_mid"],
               packed["w1"], packed["b1"],
               packed["w2"], packed["b2"],
               packed["w3"], packed["b3"],
               packed["wq"], packed["bq"])

    # Weights/biases: full-array block with a constant index_map -> fetched
    # once and kept VMEM-resident across all batch tiles.
    resident = lambda w: pl.BlockSpec(w.shape, lambda i: (0, 0))
    in_specs = [pl.BlockSpec((TB, Din), lambda i: (i, 0))]
    in_specs += [resident(w) for w in weights]
    out_specs = pl.BlockSpec((TB, 1), lambda i: (i, 0))

    flops = 2 * Bp * (Din * 64 + 64 * 64 + 64 * L + 2 * L * L + L)
    bytes_accessed = (int(x.size) * x.dtype.itemsize + Bp * 4
                      + sum(int(w.size) * w.dtype.itemsize for w in weights))

    out = pl.pallas_call(
        critic_kernel,
        out_shape=jax.ShapeDtypeStruct((Bp, 1), jnp.float32),
        grid=grid,
        in_specs=in_specs,
        out_specs=out_specs,
        compiler_params=pltpu.CompilerParams(
            dimension_semantics=("parallel",)),   # v7x: shard batch over 2 TCs
        cost_estimate=pl.CostEstimate(
            flops=flops, transcendentals=0, bytes_accessed=bytes_accessed),
    )(x, *weights)
    return out[:B]


def critic_forward_ref(state, action, raw):
    """Pure-JAX reference with matching numerics (bf16 weights, f32 accum)."""
    relu = lambda t: jnp.maximum(t, 0.0)

    def lin(x, w, b):
        return jnp.dot(x.astype(jnp.bfloat16), w.astype(jnp.bfloat16),
                       preferred_element_type=jnp.float32) + b

    s = relu(lin(state, raw["ws1"], raw["bs1"]))
    s = relu(lin(s, raw["ws2"], raw["bs2"]))
    a = relu(lin(action, raw["wa"], raw["ba"]))
    h = jnp.concatenate([s, a], axis=1)
    h = relu(lin(h, raw["w1"], raw["b1"]))
    h = relu(lin(h, raw["w2"], raw["b2"]))
    h = relu(lin(h, raw["w3"], raw["b3"]))
    return lin(h, raw["wq"], raw["bq"])


if __name__ == "__main__":
    key = jax.random.PRNGKey(0)
    k_params, k_state, k_action = jax.random.split(key, 3)

    batch = 8
    state_dim, action_dim = 16, 8          # inputs_dim = (16, 8)
    layer_size = 256

    raw_params = make_critic_params(k_params, (state_dim, action_dim), layer_size)
    packed_params = pack_critic_params(raw_params)

    state = jax.random.normal(k_state, (batch, state_dim), jnp.float32)
    action = jax.random.normal(k_action, (batch, action_dim), jnp.float32)

    q = critic_forward(state, action, packed_params)
    jax.block_until_ready(q)

    q_ref = critic_forward_ref(state, action, raw_params)
    assert q.shape == (batch, 1)
    err = jnp.max(jnp.abs(q - q_ref))
    assert jnp.allclose(q, q_ref, atol=1e-4, rtol=1e-4), f"mismatch vs reference (max abs err {err})"

    print("KERNEL_OK")
</pallas_src>

<mosaic_0001>
module attributes {stable_mosaic.version = 11 : i64} {
  func.func @critic_kernel(%arg0: i32, %arg1: memref<8x24xbf16, #tpu.memory_space<vmem>>, %arg2: memref<24x64xbf16, #tpu.memory_space<vmem>>, %arg3: memref<1x64xf32, #tpu.memory_space<vmem>>, %arg4: memref<64x64xbf16, #tpu.memory_space<vmem>>, %arg5: memref<1x64xf32, #tpu.memory_space<vmem>>, %arg6: memref<64x256xbf16, #tpu.memory_space<vmem>>, %arg7: memref<1x256xf32, #tpu.memory_space<vmem>>, %arg8: memref<256x256xbf16, #tpu.memory_space<vmem>>, %arg9: memref<1x256xf32, #tpu.memory_space<vmem>>, %arg10: memref<256x256xbf16, #tpu.memory_space<vmem>>, %arg11: memref<1x256xf32, #tpu.memory_space<vmem>>, %arg12: memref<256x1xbf16, #tpu.memory_space<vmem>>, %arg13: memref<1x1xf32, #tpu.memory_space<vmem>>, %arg14: memref<8x1xf32, #tpu.memory_space<vmem>>) attributes {dimension_semantics = [#tpu.dimension_semantics<parallel>], iteration_bounds = array<i64: 1>, scalar_prefetch = 0 : i64, scratch_operands = 0 : i64, tpu.core_type = #tpu.core_type<tc>, window_params = [{transform_indices = @transform_0, window_bounds = array<i64: 8, 24>}, {pipeline_mode = #tpu.pipeline_mode<synchronous>, transform_indices = @transform_1, window_bounds = array<i64: 24, 64>}, {pipeline_mode = #tpu.pipeline_mode<synchronous>, transform_indices = @transform_2, window_bounds = array<i64: 1, 64>}, {pipeline_mode = #tpu.pipeline_mode<synchronous>, transform_indices = @transform_3, window_bounds = array<i64: 64, 64>}, {pipeline_mode = #tpu.pipeline_mode<synchronous>, transform_indices = @transform_4, window_bounds = array<i64: 1, 64>}, {pipeline_mode = #tpu.pipeline_mode<synchronous>, transform_indices = @transform_5, window_bounds = array<i64: 64, 256>}, {pipeline_mode = #tpu.pipeline_mode<synchronous>, transform_indices = @transform_6, window_bounds = array<i64: 1, 256>}, {pipeline_mode = #tpu.pipeline_mode<synchronous>, transform_indices = @transform_7, window_bounds = array<i64: 256, 256>}, {pipeline_mode = #tpu.pipeline_mode<synchronous>, transform_indices = @transform_8, window_bounds = array<i64: 1, 256>}, {pipeline_mode = #tpu.pipeline_mode<synchronous>, transform_indices = @transform_9, window_bounds = array<i64: 256, 256>}, {pipeline_mode = #tpu.pipeline_mode<synchronous>, transform_indices = @transform_10, window_bounds = array<i64: 1, 256>}, {pipeline_mode = #tpu.pipeline_mode<synchronous>, transform_indices = @transform_11, window_bounds = array<i64: 256, 1>}, {pipeline_mode = #tpu.pipeline_mode<synchronous>, transform_indices = @transform_12, window_bounds = array<i64: 1, 1>}, {transform_indices = @transform_13, window_bounds = array<i64: 8, 1>}]} {
    %c0 = arith.constant 0 : index
    %c0_0 = arith.constant 0 : index
    %0 = vector.load %arg1[%c0, %c0_0] : memref<8x24xbf16, #tpu.memory_space<vmem>>, vector<8x24xbf16>
    %c0_1 = arith.constant 0 : index
    %c0_2 = arith.constant 0 : index
    %1 = vector.load %arg2[%c0_1, %c0_2] : memref<24x64xbf16, #tpu.memory_space<vmem>>, vector<24x64xbf16>
    %cst = arith.constant dense<0.000000e+00> : vector<8x64xf32>
    %2 = tpu.matmul %0, %1, %cst {dimension_numbers = #tpu.dot_dimension_numbers<[1], [0], [0], [1], [0, 0, 1, 1], [], []>} : vector<8x24xbf16>, vector<24x64xbf16>, vector<8x64xf32> -> vector<8x64xf32>
    %c0_3 = arith.constant 0 : index
    %c0_4 = arith.constant 0 : index
    %3 = vector.load %arg3[%c0_3, %c0_4] : memref<1x64xf32, #tpu.memory_space<vmem>>, vector<1x64xf32>
    %4 = vector.broadcast %3 : vector<1x64xf32> to vector<8x64xf32>
    %5 = arith.addf %2, %4 : vector<8x64xf32>
    %cst_5 = arith.constant 0.000000e+00 : f32
    %6 = vector.broadcast %cst_5 : f32 to vector<8x64xf32>
    %7 = arith.maximumf %5, %6 : vector<8x64xf32>
    %8 = arith.truncf %7 : vector<8x64xf32> to vector<8x64xbf16>
    %c0_6 = arith.constant 0 : index
    %c0_7 = arith.constant 0 : index
    %9 = vector.load %arg4[%c0_6, %c0_7] : memref<64x64xbf16, #tpu.memory_space<vmem>>, vector<64x64xbf16>
    %cst_8 = arith.constant dense<0.000000e+00> : vector<8x64xf32>
    %10 = tpu.matmul %8, %9, %cst_8 {dimension_numbers = #tpu.dot_dimension_numbers<[1], [0], [0], [1], [0, 0, 1, 1], [], []>} : vector<8x64xbf16>, vector<64x64xbf16>, vector<8x64xf32> -> vector<8x64xf32>
    %c0_9 = arith.constant 0 : index
    %c0_10 = arith.constant 0 : index
    %11 = vector.load %arg5[%c0_9, %c0_10] : memref<1x64xf32, #tpu.memory_space<vmem>>, vector<1x64xf32>
    %12 = vector.broadcast %11 : vector<1x64xf32> to vector<8x64xf32>
    %13 = arith.addf %10, %12 : vector<8x64xf32>
    %cst_11 = arith.constant 0.000000e+00 : f32
    %14 = vector.broadcast %cst_11 : f32 to vector<8x64xf32>
    %15 = arith.maximumf %13, %14 : vector<8x64xf32>
    %16 = arith.truncf %15 : vector<8x64xf32> to vector<8x64xbf16>
    %c0_12 = arith.constant 0 : index
    %c0_13 = arith.constant 0 : index
    %17 = vector.load %arg6[%c0_12, %c0_13] : memref<64x256xbf16, #tpu.memory_space<vmem>>, vector<64x256xbf16>
    %cst_14 = arith.constant dense<0.000000e+00> : vector<8x256xf32>
    %18 = tpu.matmul %16, %17, %cst_14 {dimension_numbers = #tpu.dot_dimension_numbers<[1], [0], [0], [1], [0, 0, 1, 1], [], []>} : vector<8x64xbf16>, vector<64x256xbf16>, vector<8x256xf32> -> vector<8x256xf32>
    %c0_15 = arith.constant 0 : index
    %c0_16 = arith.constant 0 : index
    %19 = vector.load %arg7[%c0_15, %c0_16] : memref<1x256xf32, #tpu.memory_space<vmem>>, vector<1x256xf32>
    %20 = vector.broadcast %19 : vector<1x256xf32> to vector<8x256xf32>
    %21 = arith.addf %18, %20 : vector<8x256xf32>
    %cst_17 = arith.constant 0.000000e+00 : f32
    %22 = vector.broadcast %cst_17 : f32 to vector<8x256xf32>
    %23 = arith.maximumf %21, %22 : vector<8x256xf32>
    %24 = arith.truncf %23 : vector<8x256xf32> to vector<8x256xbf16>
    %c0_18 = arith.constant 0 : index
    %c0_19 = arith.constant 0 : index
    %25 = vector.load %arg8[%c0_18, %c0_19] : memref<256x256xbf16, #tpu.memory_space<vmem>>, vector<256x256xbf16>
    %cst_20 = arith.constant dense<0.000000e+00> : vector<8x256xf32>
    %26 = tpu.matmul %24, %25, %cst_20 {dimension_numbers = #tpu.dot_dimension_numbers<[1], [0], [0], [1], [0, 0, 1, 1], [], []>} : vector<8x256xbf16>, vector<256x256xbf16>, vector<8x256xf32> -> vector<8x256xf32>
    %c0_21 = arith.constant 0 : index
    %c0_22 = arith.constant 0 : index
    %27 = vector.load %arg9[%c0_21, %c0_22] : memref<1x256xf32, #tpu.memory_space<vmem>>, vector<1x256xf32>
    %28 = vector.broadcast %27 : vector<1x256xf32> to vector<8x256xf32>
    %29 = arith.addf %26, %28 : vector<8x256xf32>
    %cst_23 = arith.constant 0.000000e+00 : f32
    %30 = vector.broadcast %cst_23 : f32 to vector<8x256xf32>
    %31 = arith.maximumf %29, %30 : vector<8x256xf32>
    %32 = arith.truncf %31 : vector<8x256xf32> to vector<8x256xbf16>
    %c0_24 = arith.constant 0 : index
    %c0_25 = arith.constant 0 : index
    %33 = vector.load %arg10[%c0_24, %c0_25] : memref<256x256xbf16, #tpu.memory_space<vmem>>, vector<256x256xbf16>
    %cst_26 = arith.constant dense<0.000000e+00> : vector<8x256xf32>
    %34 = tpu.matmul %32, %33, %cst_26 {dimension_numbers = #tpu.dot_dimension_numbers<[1], [0], [0], [1], [0, 0, 1, 1], [], []>} : vector<8x256xbf16>, vector<256x256xbf16>, vector<8x256xf32> -> vector<8x256xf32>
    %c0_27 = arith.constant 0 : index
    %c0_28 = arith.constant 0 : index
    %35 = vector.load %arg11[%c0_27, %c0_28] : memref<1x256xf32, #tpu.memory_space<vmem>>, vector<1x256xf32>
    %36 = vector.broadcast %35 : vector<1x256xf32> to vector<8x256xf32>
    %37 = arith.addf %34, %36 : vector<8x256xf32>
    %cst_29 = arith.constant 0.000000e+00 : f32
    %38 = vector.broadcast %cst_29 : f32 to vector<8x256xf32>
    %39 = arith.maximumf %37, %38 : vector<8x256xf32>
    %40 = arith.truncf %39 : vector<8x256xf32> to vector<8x256xbf16>
    %c0_30 = arith.constant 0 : index
    %c0_31 = arith.constant 0 : index
    %41 = vector.load %arg12[%c0_30, %c0_31] : memref<256x1xbf16, #tpu.memory_space<vmem>>, vector<256x1xbf16>
    %cst_32 = arith.constant dense<0.000000e+00> : vector<8x1xf32>
    %42 = tpu.matmul %40, %41, %cst_32 {dimension_numbers = #tpu.dot_dimension_numbers<[1], [0], [0], [1], [0, 0, 1, 1], [], []>} : vector<8x256xbf16>, vector<256x1xbf16>, vector<8x1xf32> -> vector<8x1xf32>
    %c0_33 = arith.constant 0 : index
    %c0_34 = arith.constant 0 : index
    %43 = vector.load %arg13[%c0_33, %c0_34] : memref<1x1xf32, #tpu.memory_space<vmem>>, vector<1x1xf32>
    %44 = vector.broadcast %43 : vector<1x1xf32> to vector<8x1xf32>
    %45 = arith.addf %42, %44 : vector<8x1xf32>
    %c0_35 = arith.constant 0 : index
    %c0_36 = arith.constant 0 : index
    %46 = vector.load %arg14[%c0_35, %c0_36] : memref<8x1xf32, #tpu.memory_space<vmem>>, vector<8x1xf32>
    tpu.vector_store %arg14[%c0_35, %c0_36], %45 {strides = array<i32>} : memref<8x1xf32, #tpu.memory_space<vmem>>, vector<8x1xf32>,
    return
  }
  func.func @transform_0(%arg0: i32) -> (i32, i32) {
    %c0_i32 = arith.constant 0 : i32
    %c0_i32_0 = arith.constant 0 : i32
    return %arg0, %c0_i32 : i32, i32
  }
  func.func @transform_1(%arg0: i32) -> (i32, i32) {
    %c0_i32 = arith.constant 0 : i32
    %c0_i32_0 = arith.constant 0 : i32
    %c0_i32_1 = arith.constant 0 : i32
    return %c0_i32, %c0_i32_0 : i32, i32
  }
  func.func @transform_2(%arg0: i32) -> (i32, i32) {
    %c0_i32 = arith.constant 0 : i32
    %c0_i32_0 = arith.constant 0 : i32
    %c0_i32_1 = arith.constant 0 : i32
    return %c0_i32, %c0_i32_0 : i32, i32
  }
  func.func @transform_3(%arg0: i32) -> (i32, i32) {
    %c0_i32 = arith.constant 0 : i32
    %c0_i32_0 = arith.constant 0 : i32
    %c0_i32_1 = arith.constant 0 : i32
    return %c0_i32, %c0_i32_0 : i32, i32
  }
  func.func @transform_4(%arg0: i32) -> (i32, i32) {
    %c0_i32 = arith.constant 0 : i32
    %c0_i32_0 = arith.constant 0 : i32
    %c0_i32_1 = arith.constant 0 : i32
    return %c0_i32, %c0_i32_0 : i32, i32
  }
  func.func @transform_5(%arg0: i32) -> (i32, i32) {
    %c0_i32 = arith.constant 0 : i32
    %c0_i32_0 = arith.constant 0 : i32
    %c0_i32_1 = arith.constant 0 : i32
    return %c0_i32, %c0_i32_0 : i32, i32
  }
  func.func @transform_6(%arg0: i32) -> (i32, i32) {
    %c0_i32 = arith.constant 0 : i32
    %c0_i32_0 = arith.constant 0 : i32
    %c0_i32_1 = arith.constant 0 : i32
    return %c0_i32, %c0_i32_0 : i32, i32
  }
  func.func @transform_7(%arg0: i32) -> (i32, i32) {
    %c0_i32 = arith.constant 0 : i32
    %c0_i32_0 = arith.constant 0 : i32
    %c0_i32_1 = arith.constant 0 : i32
    return %c0_i32, %c0_i32_0 : i32, i32
  }
  func.func @transform_8(%arg0: i32) -> (i32, i32) {
    %c0_i32 = arith.constant 0 : i32
    %c0_i32_0 = arith.constant 0 : i32
    %c0_i32_1 = arith.constant 0 : i32
    return %c0_i32, %c0_i32_0 : i32, i32
  }
  func.func @transform_9(%arg0: i32) -> (i32, i32) {
    %c0_i32 = arith.constant 0 : i32
    %c0_i32_0 = arith.constant 0 : i32
    %c0_i32_1 = arith.constant 0 : i32
    return %c0_i32, %c0_i32_0 : i32, i32
  }
  func.func @transform_10(%arg0: i32) -> (i32, i32) {
    %c0_i32 = arith.constant 0 : i32
    %c0_i32_0 = arith.constant 0 : i32
    %c0_i32_1 = arith.constant 0 : i32
    return %c0_i32, %c0_i32_0 : i32, i32
  }
  func.func @transform_11(%arg0: i32) -> (i32, i32) {
    %c0_i32 = arith.constant 0 : i32
    %c0_i32_0 = arith.constant 0 : i32
    %c0_i32_1 = arith.constant 0 : i32
    return %c0_i32, %c0_i32_0 : i32, i32
  }
  func.func @transform_12(%arg0: i32) -> (i32, i32) {
    %c0_i32 = arith.constant 0 : i32
    %c0_i32_0 = arith.constant 0 : i32
    %c0_i32_1 = arith.constant 0 : i32
    return %c0_i32, %c0_i32_0 : i32, i32
  }
  func.func @transform_13(%arg0: i32) -> (i32, i32) {
    %c0_i32 = arith.constant 0 : i32
    %c0_i32_0 = arith.constant 0 : i32
    return %arg0, %c0_i32 : i32, i32
  }
}

</mosaic_0001>

<bundles_post_ra>
// kernel: tpu_custom_call.1
= control target key start
LH: loop header
LB: loop body
LE: loop exit
PB: predicated region body
PF: predicated region fallthrough
CT: control target
= control target key end

     0   :  { %s1583_s0 = inlined_call_operand.vmem [shape: bf16[8,24], index: 0, kind: input, shape index: {}]   ;;  %s1584_s1 = inlined_call_operand.vmem [shape: bf16[24,64], index: 1, kind: input, shape index: {}]   ;;  %s1585_s2 = inlined_call_operand.vmem [shape: f32[1,64], index: 2, kind: input, shape index: {}]   ;;  %s1586_s3 = inlined_call_operand.vmem [shape: bf16[64,64], index: 3, kind: input, shape index: {}]   ;;  %s1587_s4 = inlined_call_operand.vmem [shape: f32[1,64], index: 4, kind: input, shape index: {}]   ;;  %s1588_s5 = inlined_call_operand.vmem [shape: bf16[64,256], index: 5, kind: input, shape index: {}]   ;;  %s1589_s6 = inlined_call_operand.vmem [shape: f32[1,256], index: 6, kind: input, shape index: {}]   ;;  %s1590_s7 = inlined_call_operand.hbm [shape: bf16[256,256], index: 7, kind: input, shape index: {}]   ;;  %s1591_s8 = inlined_call_operand.vmem [shape: f32[1,256], index: 8, kind: input, shape index: {}]   ;;  %s1592_s9 = inlined_call_operand.hbm [shape: bf16[256,256], index: 9, kind: input, shape index: {}]   ;;  %s1593_s10 = inlined_call_operand.vmem [shape: f32[1,256], index: 10, kind: input, shape index: {}]   ;;  %s1594_s11 = inlined_call_operand.vmem [shape: bf16[256,1], index: 11, kind: input, shape index: {}]   ;;  %s1595_s12 = inlined_call_operand.<no memory space> [shape: f32[1,1], index: 12, kind: input, shape index: {}]   ;;  %s1596_s13 = inlined_call_operand.vmem [shape: f32[8,1], index: 13, kind: output, shape index: {}]  }
   0x1   :  { %v18_v0 = vstv %s1595_s12 }
   0x2   :  { %19 = vst [vmem:[#allocation2] sm:$0x1] %v18_v0 }
   0x3   :  { %20 = vsyncpa [#allocation4], 0 }
   0x4   :  { %21 = vsyncpa [#allocation6], 0  ;;  %s1354_s27 = smov [#allocation3]   ;;  %s1306_s14 = scalar_lea.hbm %s1590_s7, 4096 }
   0x5   :  { %s41_s28 = sshll.u32 %s1354_s27, 4  ;;  %p1307_p0 = scmp.ne.s32.totalorder %s1590_s7, %s1306_s14  ;;  %s42_s28 = int_to_ptr.vmem [resolvable:$true] %s41_s28 }
   0x6   :  { %p1310_p1 = scmp.lt.u32.totalorder %s1306_s14, %s1590_s7 }
   0x8   :  { %p1312_p2 = pnand %p1310_p1, %p1307_p0 }
   0xa   :  { %1315 = shalt.err (!%p1312_p2)
}
   0xb   :  { %s1316_s12 = scalar_lea.vmem %s42_s28, 4096  ;;  %p1321_p4 = scmp.lt.s32.totalorder %s42_s28, %s42_s28 }
   0xc   :  { %p1317_p3 = scmp.ne.s32.totalorder %s42_s28, %s1316_s12  ;;  %p1322_p5 = scmp.lt.s32.totalorder %s1316_s12, %s1316_s12 }
   0xe   :  { %p1323_p6 = por %p1322_p5, %p1321_p4 }
  0x10   :  { %p1324_p7 = pnand %p1323_p6, %p1317_p3 }
  0x12   :  { %1327 = shalt.err (!%p1324_p7)
}
  0x13   :  { %s1355_s19 = smov 128   ;;  %s1356_s20 = smov 8  }
  0x14   :  { %47 = dma.hbm_to_vmem [thread:$0]  %s1590_s7, 4096, %s42_s28, [#allocation4], %s1355_s19, %s1355_s19, %s1356_s20  }
  0x15   :  { %s1357_s23 = smov [#allocation5]   ;;  %s1328_s27 = scalar_lea.hbm %s1592_s9, 4096 }
  0x16   :  { %s55_s24 = sshll.u32 %s1357_s23, 4  ;;  %p1329_p8 = scmp.ne.s32.totalorder %s1592_s9, %s1328_s27  ;;  %s56_s24 = int_to_ptr.vmem [resolvable:$true] %s55_s24 }
  0x17   :  { %p1332_p9 = scmp.lt.u32.totalorder %s1328_s27, %s1592_s9 }
  0x19   :  { %p1334_p10 = pnand %p1332_p9, %p1329_p8 }
  0x1b   :  { %1337 = shalt.err (!%p1334_p10)
}
  0x1c   :  { %s1338_s16 = scalar_lea.vmem %s56_s24, 4096  ;;  %p1343_p12 = scmp.lt.s32.totalorder %s56_s24, %s56_s24 }
  0x1d   :  { %p1339_p11 = scmp.ne.s32.totalorder %s56_s24, %s1338_s16  ;;  %p1344_p13 = scmp.lt.s32.totalorder %s1338_s16, %s1338_s16 }
  0x1f   :  { %p1345_p0 = por %p1344_p13, %p1343_p12 }
  0x21   :  { %p1346_p1 = pnand %p1345_p0, %p1339_p11 }
  0x23   :  { %1349 = shalt.err (!%p1346_p1)
}
  0x24   :  { %61 = dma.hbm_to_vmem [thread:$0]  %s1592_s9, 4096, %s56_s24, [#allocation6], %s1355_s19, %s1355_s19, %s1356_s20  }
  0x25   :  { %1350 = dma.done.wait [#allocation4], 4096  }
  0x26   :  { %1351 = vsyncadd [#allocation4], 4294963200 }
  0x27   :  { %1352 = dma.done.wait [#allocation6], 4096  }
  0x28   :  { %1353 = vsyncadd [#allocation6], 4294963200  ;;  %v1358_v1 = vmov 0.0   ;;  %vm1359_vm0 = vmmov 0   ;;  %v1176_v2 = vld [vmem:[%s1584_s1] sm:$0xff]   ;;  %vm99_vm1 = vcmask 1043456  }
  0x29   :  { %1149 = vmatprep.subr.bf16.mxu0 %v1358_v1  ;;  %1153 = vmatprep.mubr.msk.bf16.mxu0 %vm1359_vm0, %v1358_v1  ;;  %v1177_v3 = vld [vmem:[%s1584_s1 + $0x8] ss:$0 sps:$4 sm:$0xff]   ;;  %v75_v5 = vld [vmem:[%s1583_s0] sm:$0xf]  ;;  %vm95_vm2 = vcmask 195584   ;;  %v1180_v8 = vld [vmem:[%s1586_s3 + $0x10] sm:$0xff]  }
  0x2a   :  { %1150 = vmatpush3.bf16.msra.mxu0 %v1176_v2  ;;  %v101_v4 = vsel %vm99_vm1, %v1177_v3, 0  ;;  %v1178_v6 = vld [vmem:[%s1586_s3] sm:$0xff]   ;;  %v1179_v7 = vld [vmem:[%s1586_s3 + $0x8] sm:$0xff]   ;;  %v1181_v9 = vld [vmem:[%s1586_s3 + $0x18] sm:$0xff]   ;;  %vm184_vm3 = vcmask 523264   ;;  %v1360_v26 = vmov 0  }
  0x2b   :  { %1151 = vmatprep.subr.bf16.mxu0 %v1358_v1  ;;  %v1184_v10 = vld [vmem:[%s1588_s5 + $0x4] ss:$8 sps:$4 sm:$0xff]   ;;  %v1019_v11 = vld [vmem:[%s1585_s2] ss:$0 sm:$0xff]  ;;  %v1187_v20 = vld [vmem:[%s1588_s5 + $0x14] ss:$8 sps:$4 sm:$0xff]  }
  0x2c   :  { %v1182_v18 = vld [vmem:[%s1588_s5] ss:$8 sps:$4 sm:$0xff]   ;;  %v1185_v21 = vld [vmem:[%s1588_s5 + $0x10] ss:$8 sps:$4 sm:$0xff]   ;;  %v1190_v22 = vld [vmem:[%s1588_s5 + $0x24] ss:$8 sps:$4 sm:$0xff]  }
  0x2d   :  { %v1188_v23 = vld [vmem:[%s1588_s5 + $0x20] ss:$8 sps:$4 sm:$0xff]   ;;  %v1193_v24 = vld [vmem:[%s1588_s5 + $0x34] ss:$8 sps:$4 sm:$0xff]   ;;  %v1191_v25 = vld [vmem:[%s1588_s5 + $0x30] ss:$8 sps:$4 sm:$0xff]  }
  0x2e   :  { %1152 = vmatpush3.bf16.msra.mxu0 %v101_v4  ;;  %v1194_v27 = vld [vmem:[#allocation3 + $0x4] ss:$8 sps:$4 sm:$0xff]   ;;  %v1196_v28 = vld [vmem:[#allocation3] ss:$8 sps:$4 sm:$0xff]   ;;  %v1197_v29 = vld [vmem:[#allocation3 + $0x14] ss:$8 sps:$4 sm:$0xff]  }
  0x2f   :  { %1157 = vmatprep.subr.bf16.mxu0 %v1358_v1  ;;  %542 = vmatprep.subr.bf16.mxu1 %v1194_v27  ;;  %v1199_v30 = vld [vmem:[#allocation3 + $0x10] ss:$8 sps:$4 sm:$0xff]   ;;  %v1200_v31 = vld [vmem:[#allocation3 + $0x24] ss:$8 sps:$4 sm:$0xff]   ;;  %v1202_v32 = vld [vmem:[#allocation3 + $0x20] ss:$8 sps:$4 sm:$0xff]  }
  0x30   :  { %543 = vmatpush1.bf16.msra.mxu1 %v1196_v28  ;;  %v1203_v33 = vld [vmem:[#allocation3 + $0x34] ss:$8 sps:$4 sm:$0xff]   ;;  %v1205_v34 = vld [vmem:[#allocation3 + $0x30] ss:$8 sps:$4 sm:$0xff]   ;;  %v1206_v35 = vld [vmem:[#allocation3 + $0x44] ss:$8 sps:$4 sm:$0xff]  }
  0x31   :  { %1154 = vmatmul.mubr.msk.bf16.vlgmr.msra.gmra.mrb[0].mxu0 %vm95_vm2, %v75_v5  ;;  %544 = vmatprep.subr.bf16.mxu1 %v1197_v29  ;;  %v1208_v36 = vld [vmem:[#allocation3 + $0x40] ss:$8 sps:$4 sm:$0xff]   ;;  %v1209_v37 = vld [vmem:[#allocation3 + $0x54] ss:$8 sps:$4 sm:$0xff]   ;;  %v1211_v38 = vld [vmem:[#allocation3 + $0x50] ss:$8 sps:$4 sm:$0xff]  }
  0x32   :  { %1158 = vmatpush3.bf16.msra.mxu0 %v1178_v6  ;;  %1165 = vmatprep.mubr.msk.bf16.mxu0 %vm1359_vm0, %v1358_v1  ;;  %v1212_v39 = vld [vmem:[#allocation3 + $0x64] ss:$8 sps:$4 sm:$0xff]   ;;  %v1214_v40 = vld [vmem:[#allocation3 + $0x60] ss:$8 sps:$4 sm:$0xff]   ;;  %v1215_v41 = vld [vmem:[#allocation3 + $0x74] ss:$8 sps:$4 sm:$0xff]  }
  0x33   :  { %1159 = vmatprep.subr.bf16.mxu0 %v1358_v1  ;;  %v1217_v42 = vld [vmem:[#allocation3 + $0x70] ss:$8 sps:$4 sm:$0xff]   ;;  %v1218_v43 = vld [vmem:[#allocation3 + $0x84] ss:$8 sps:$4 sm:$0xff]   ;;  %v1220_v44 = vld [vmem:[#allocation3 + $0x80] ss:$8 sps:$4 sm:$0xff]  }
  0x34   :  { %545 = vmatpush1.bf16.msra.mxu1 %v1199_v30  ;;  %v1221_v45 = vld [vmem:[#allocation3 + $0x94] ss:$8 sps:$4 sm:$0xff]   ;;  %v1223_v46 = vld [vmem:[#allocation3 + $0x90] ss:$8 sps:$4 sm:$0xff]   ;;  %v1224_v47 = vld [vmem:[#allocation3 + $0xa4] ss:$8 sps:$4 sm:$0xff]  }
  0x35   :  { %546 = vmatprep.subr.bf16.mxu1 %v1200_v31  ;;  %v1226_v48 = vld [vmem:[#allocation3 + $0xa0] ss:$8 sps:$4 sm:$0xff]   ;;  %v1227_v49 = vld [vmem:[#allocation3 + $0xb4] ss:$8 sps:$4 sm:$0xff]   ;;  %v1229_v50 = vld [vmem:[#allocation3 + $0xb0] ss:$8 sps:$4 sm:$0xff]   ;;  %v240_v31 = vlaneseq }
  0x36   :  { %1160 = vmatpush3.bf16.msra.mxu0 %v1179_v7  ;;  %v1230_v51 = vld [vmem:[#allocation3 + $0xc4] ss:$8 sps:$4 sm:$0xff]   ;;  %v1232_v52 = vld [vmem:[#allocation3 + $0xc0] ss:$8 sps:$4 sm:$0xff]   ;;  %v1233_v53 = vld [vmem:[#allocation3 + $0xd4] ss:$8 sps:$4 sm:$0xff]  }
  0x37   :  { %1161 = vmatprep.subr.bf16.mxu0 %v1358_v1  ;;  %v1235_v54 = vld [vmem:[#allocation3 + $0xd0] ss:$8 sps:$4 sm:$0xff]   ;;  %v1023_v55 = vld [vmem:[%s1587_s4] ss:$0 sm:$0xff]  ;;  %v1236_v63 = vld [vmem:[#allocation3 + $0xe4] ss:$8 sps:$4 sm:$0xff]  }
  0x38   :  { %547 = vmatpush1.bf16.msra.mxu1 %v1202_v32  ;;  %v1238_v0 = vld [vmem:[#allocation3 + $0xe0] ss:$8 sps:$4 sm:$0xff]   ;;  %v1241_v2 = vld [vmem:[#allocation3 + $0xf0] ss:$8 sps:$4 sm:$0xff]   ;;  %v1244_v4 = vld [vmem:[#allocation5 + $0x4] ss:$8 sps:$4 sm:$0xff]  }
  0x39   :  { %548 = vmatprep.subr.bf16.mxu1 %v1203_v33  ;;  %v1242_v3 = vld [vmem:[#allocation5] ss:$8 sps:$4 sm:$0xff]   ;;  %v1247_v5 = vld [vmem:[#allocation5 + $0x14] ss:$8 sps:$4 sm:$0xff]   ;;  %v1245_v6 = vld [vmem:[#allocation5 + $0x10] ss:$8 sps:$4 sm:$0xff]  }
  0x3a   :  { %1162 = vmatpush3.bf16.msra.mxu0 %v1180_v8  ;;  %v1250_v7 = vld [vmem:[#allocation5 + $0x24] ss:$8 sps:$4 sm:$0xff]   ;;  %v1248_v8 = vld [vmem:[#allocation5 + $0x20] ss:$8 sps:$4 sm:$0xff]   ;;  %v1283_v29 = vld [vmem:[#allocation5 + $0xd4] ss:$8 sps:$4 sm:$0xff]  }
  0x3b   :  { %1163 = vmatprep.subr.bf16.mxu0 %v1358_v1  ;;  %v1239_v1 = vld [vmem:[#allocation3 + $0xf4] ss:$8 sps:$4 sm:$0xff]   ;;  %v1280_v27 = vld [vmem:[#allocation5 + $0xc4] ss:$8 sps:$4 sm:$0xff]   ;;  %v1278_v28 = vld [vmem:[#allocation5 + $0xc0] ss:$8 sps:$4 sm:$0xff]  }
  0x3c   :  { %549 = vmatpush1.bf16.msra.mxu1 %v1205_v34  ;;  %v1281_v30 = vld [vmem:[#allocation5 + $0xd0] ss:$8 sps:$4 sm:$0xff]   ;;  %v241_v32 = vshrl.u32 %v240_v31, 7  ;;  %v238_v34 = vld [vmem:[%s1589_s6] sm:$0x3]  ;;  %vm1011_vm4 = vcmask 7168  }
  0x3d   :  { %550 = vmatprep.subr.bf16.mxu1 %v1206_v35  ;;  %v1102_v31 = vld [vmem:[#allocation2] ss:$0 sm:$0xff] }
  0x3e   :  { %1164 = vmatpush3.bf16.msra.mxu0 %v1181_v9  ;;  %v1253_v9 = vld [vmem:[#allocation5 + $0x34] ss:$8 sps:$4 sm:$0xff]   ;;  %v1513_v33 = vsub.s32 0, %v241_v32  ;;  %v1518_v35 = vsub.s32 1, %v241_v32 }
  0x3f   :  { %293 = vmatprep.subr.bf16.mxu0 %v1184_v10  ;;  %v1251_v10 = vld [vmem:[#allocation5 + $0x30] ss:$8 sps:$4 sm:$0xff]  }
  0x40   :  { %551 = vmatpush1.bf16.msra.mxu1 %v1208_v36  ;;  %v243_v36 = vrot.slane %v238_v34, %v1513_v33 }
  0x41   :  { %552 = vmatprep.subr.bf16.mxu1 %v1209_v37  ;;  %v247_v37 = vrot.slane %v238_v34, %v1518_v35 }
  0x44   :  { %553 = vmatpush1.bf16.msra.mxu1 %v1211_v38 }
  0x45   :  { %554 = vmatprep.subr.bf16.mxu1 %v1212_v39 }
  0x48   :  { %555 = vmatpush1.bf16.msra.mxu1 %v1214_v40 }
  0x49   :  { %556 = vmatprep.subr.bf16.mxu1 %v1215_v41 }
  0x4c   :  { %557 = vmatpush1.bf16.msra.mxu1 %v1217_v42 }
  0x4d   :  { %558 = vmatprep.subr.bf16.mxu1 %v1218_v43 }
  0x50   :  { %559 = vmatpush1.bf16.msra.mxu1 %v1220_v44 }
  0x51   :  { %560 = vmatprep.subr.bf16.mxu1 %v1221_v45 }
  0x54   :  { %561 = vmatpush1.bf16.msra.mxu1 %v1223_v46 }
  0x55   :  { %562 = vmatprep.subr.bf16.mxu1 %v1224_v47 }
  0x58   :  { %563 = vmatpush1.bf16.msra.mxu1 %v1226_v48  ;;  %v1286_v48 = vld [vmem:[#allocation5 + $0xe4] ss:$8 sps:$4 sm:$0xff]  }
  0x59   :  { %564 = vmatprep.subr.bf16.mxu1 %v1227_v49  ;;  %v1284_v49 = vld [vmem:[#allocation5 + $0xe0] ss:$8 sps:$4 sm:$0xff]  }
  0x5c   :  { %565 = vmatpush1.bf16.msra.mxu1 %v1229_v50  ;;  %v1289_v50 = vld [vmem:[#allocation5 + $0xf4] ss:$8 sps:$4 sm:$0xff]  }
  0x5d   :  { %566 = vmatprep.subr.bf16.mxu1 %v1230_v51  ;;  %v1287_v51 = vld [vmem:[#allocation5 + $0xf0] ss:$8 sps:$4 sm:$0xff]  }
  0x60   :  { %567 = vmatpush1.bf16.msra.mxu1 %v1232_v52  ;;  %v1290_v52 = vld [vmem:[%s1594_s11 + $0x40] sm:$0xff]  }
  0x61   :  { %568 = vmatprep.subr.bf16.mxu1 %v1233_v53  ;;  %v1291_v53 = vld [vmem:[%s1594_s11] sm:$0xff]  }
  0x64   :  { %569 = vmatpush1.bf16.msra.mxu1 %v1235_v54  ;;  %v1292_v54 = vld [vmem:[%s1594_s11 + $0x48] sm:$0xff]  }
  0x65   :  { %570 = vmatprep.subr.bf16.mxu1 %v1236_v63  ;;  %v1301_v63 = vld [vmem:[%s1594_s11 + $0x28] sm:$0xff]  }
  0x68   :  { %571 = vmatpush1.bf16.msra.mxu1 %v1238_v0  ;;  %v370_v0 = vld [vmem:[%s1591_s8] sm:$0x3] }
  0x69   :  { %572 = vmatprep.subr.bf16.mxu1 %v1239_v1  ;;  %v375_v1 = vrot.slane %v370_v0, %v1513_v33 }
  0x6c   :  { %573 = vmatpush1.bf16.msra.mxu1 %v1241_v2  ;;  %v379_v2 = vrot.slane %v370_v0, %v1518_v35 }
  0x6d   :  { %1127 = vmatprep.subr.bf16.mxu1 %v1290_v52 }
 0x104   :  { %v137_v12 = vpop.f32.mrb[0].mxu0 }
 0x105   :  { %v138_v13 = vadd.f32 %v1019_v11, %v137_v12  ;;  %v1155_v14 = vpop.f32.mrb[1].mxu0  ;;  %v1256_v11 = vld [vmem:[#allocation5 + $0x44] ss:$8 sps:$4 sm:$0xff]   ;;  %v1254_v12 = vld [vmem:[#allocation5 + $0x40] ss:$8 sps:$4 sm:$0xff]  }
 0x106   :  { %v140_v15 = vpop.f32.mrb[2].mxu0  ;;  %v1257_v14 = vld [vmem:[#allocation5 + $0x50] ss:$8 sps:$4 sm:$0xff]  }
 0x107   :  { %v143_v16 = vmax.f32 %v138_v13, 0.0  ;;  %v1156_v17 = vpop.f32.mrb[3].mxu0  ;;  %v1259_v13 = vld [vmem:[#allocation5 + $0x54] ss:$8 sps:$4 sm:$0xff]   ;;  %v1262_v15 = vld [vmem:[#allocation5 + $0x64] ss:$8 sps:$4 sm:$0xff]  }
 0x108   :  { %v1265_v17 = vld [vmem:[#allocation5 + $0x74] ss:$8 sps:$4 sm:$0xff]  }
 0x109   :  { %v144_v19 = vpack.c.bf16 %v143_v16, %v143_v16  ;;  %v1260_v16 = vld [vmem:[#allocation5 + $0x60] ss:$8 sps:$4 sm:$0xff]  }
 0x10b   :  { %1166 = vmatmul.mubr.msk.bf16.vlgmr.msra.gmra.mrb[4].mxu0 %vm184_vm3, %v144_v19  ;;  %v1268_v19 = vld [vmem:[#allocation5 + $0x84] ss:$8 sps:$4 sm:$0xff]  }
 0x10c   :  { %294 = vmatpush1.bf16.msra.mxu0 %v1182_v18  ;;  %325 = vmatprep.mubr.bf16.mxu0 %v1360_v26  ;;  %v1263_v18 = vld [vmem:[#allocation5 + $0x70] ss:$8 sps:$4 sm:$0xff]  }
 0x10d   :  { %295 = vmatprep.subr.bf16.mxu0 %v1187_v20  ;;  %v1266_v20 = vld [vmem:[#allocation5 + $0x80] ss:$8 sps:$4 sm:$0xff]   ;;  %v1275_v26 = vld [vmem:[#allocation5 + $0xb0] ss:$8 sps:$4 sm:$0xff]  }
 0x110   :  { %296 = vmatpush1.bf16.msra.mxu0 %v1185_v21  ;;  %v1271_v21 = vld [vmem:[#allocation5 + $0x94] ss:$8 sps:$4 sm:$0xff]  }
 0x111   :  { %297 = vmatprep.subr.bf16.mxu0 %v1190_v22  ;;  %v1269_v22 = vld [vmem:[#allocation5 + $0x90] ss:$8 sps:$4 sm:$0xff]  }
 0x114   :  { %298 = vmatpush1.bf16.msra.mxu0 %v1188_v23  ;;  %v1274_v23 = vld [vmem:[#allocation5 + $0xa4] ss:$8 sps:$4 sm:$0xff]  }
 0x115   :  { %299 = vmatprep.subr.bf16.mxu0 %v1193_v24  ;;  %v1272_v24 = vld [vmem:[#allocation5 + $0xa0] ss:$8 sps:$4 sm:$0xff]  }
 0x118   :  { %300 = vmatpush1.bf16.msra.mxu0 %v1191_v25  ;;  %v1277_v25 = vld [vmem:[#allocation5 + $0xb4] ss:$8 sps:$4 sm:$0xff]  }
 0x119   :  { %791 = vmatprep.subr.bf16.mxu0 %v1244_v4 }
 0x1de   :  { %v222_v56 = vpop.f32.mrb[4].mxu0 }
 0x1df   :  { %v223_v57 = vadd.f32 %v1023_v55, %v222_v56  ;;  %v1167_v58 = vpop.f32.mrb[5].mxu0  ;;  %v1293_v55 = vld [vmem:[%s1594_s11 + $0x8] sm:$0xff]   ;;  %v1294_v56 = vld [vmem:[%s1594_s11 + $0x50] sm:$0xff]  }
 0x1e0   :  { %v225_v59 = vpop.f32.mrb[6].mxu0  ;;  %v1296_v58 = vld [vmem:[%s1594_s11 + $0x58] sm:$0xff]  }
 0x1e1   :  { %v228_v60 = vmax.f32 %v223_v57, 0.0  ;;  %v1168_v61 = vpop.f32.mrb[7].mxu0  ;;  %v1295_v57 = vld [vmem:[%s1594_s11 + $0x10] sm:$0xff]   ;;  %v1297_v59 = vld [vmem:[%s1594_s11 + $0x18] sm:$0xff]  }
 0x1e2   :  { %v1299_v61 = vld [vmem:[%s1594_s11 + $0x20] sm:$0xff]  }
 0x1e3   :  { %v229_v62 = vpack.c.bf16 %v228_v60, %v228_v60  ;;  %v1298_v60 = vld [vmem:[%s1594_s11 + $0x60] sm:$0xff]  }
 0x1e5   :  { %1037 = vmatmul.mubr.msk.bf16.vlgmr.msra.gmra.mrb[8].mxu0 %vm184_vm3, %v229_v62  ;;  %v1300_v62 = vld [vmem:[%s1594_s11 + $0x68] sm:$0xff]  }
 0x1e6   :  { %792 = vmatpush1.bf16.msra.mxu0 %v1242_v3 }
 0x1e7   :  { %793 = vmatprep.subr.bf16.mxu0 %v1247_v5 }
 0x1ea   :  { %794 = vmatpush1.bf16.msra.mxu0 %v1245_v6 }
 0x1eb   :  { %795 = vmatprep.subr.bf16.mxu0 %v1250_v7 }
 0x1ee   :  { %796 = vmatpush1.bf16.msra.mxu0 %v1248_v8 }
 0x1ef   :  { %797 = vmatprep.subr.bf16.mxu0 %v1253_v9 }
 0x1f2   :  { %798 = vmatpush1.bf16.msra.mxu0 %v1251_v10 }
 0x1f3   :  { %799 = vmatprep.subr.bf16.mxu0 %v1256_v11 }
 0x1f6   :  { %800 = vmatpush1.bf16.msra.mxu0 %v1254_v12 }
 0x1f7   :  { %801 = vmatprep.subr.bf16.mxu0 %v1259_v13  ;;  %v1302_v13 = vld [vmem:[%s1594_s11 + $0x70] sm:$0xff]  }
 0x1fa   :  { %802 = vmatpush1.bf16.msra.mxu0 %v1257_v14  ;;  %v1303_v14 = vld [vmem:[%s1594_s11 + $0x30] sm:$0xff]  }
 0x1fb   :  { %803 = vmatprep.subr.bf16.mxu0 %v1262_v15  ;;  %v1304_v15 = vld [vmem:[%s1594_s11 + $0x78] sm:$0xff]  }
 0x1fe   :  { %804 = vmatpush1.bf16.msra.mxu0 %v1260_v16  ;;  %v1305_v16 = vld [vmem:[%s1594_s11 + $0x38] sm:$0xff]  }
 0x1ff   :  { %805 = vmatprep.subr.bf16.mxu0 %v1265_v17  ;;  %v619_v17 = vld [vmem:[%s1593_s10] sm:$0x3] }
 0x202   :  { %806 = vmatpush1.bf16.msra.mxu0 %v1263_v18  ;;  %v624_v18 = vrot.slane %v619_v17, %v1513_v33 }
 0x203   :  { %807 = vmatprep.subr.bf16.mxu0 %v1268_v19  ;;  %v628_v19 = vrot.slane %v619_v17, %v1518_v35 }
 0x206   :  { %808 = vmatpush1.bf16.msra.mxu0 %v1266_v20 }
 0x207   :  { %809 = vmatprep.subr.bf16.mxu0 %v1271_v21 }
 0x20a   :  { %810 = vmatpush1.bf16.msra.mxu0 %v1269_v22 }
 0x20b   :  { %811 = vmatprep.subr.bf16.mxu0 %v1274_v23 }
 0x20e   :  { %812 = vmatpush1.bf16.msra.mxu0 %v1272_v24 }
 0x20f   :  { %813 = vmatprep.subr.bf16.mxu0 %v1277_v25 }
 0x212   :  { %814 = vmatpush1.bf16.msra.mxu0 %v1275_v26 }
 0x213   :  { %815 = vmatprep.subr.bf16.mxu0 %v1280_v27 }
 0x216   :  { %816 = vmatpush1.bf16.msra.mxu0 %v1278_v28 }
 0x217   :  { %817 = vmatprep.subr.bf16.mxu0 %v1283_v29 }
 0x21a   :  { %818 = vmatpush1.bf16.msra.mxu0 %v1281_v30 }
 0x21b   :  { %819 = vmatprep.subr.bf16.mxu0 %v1286_v48 }
 0x21e   :  { %820 = vmatpush1.bf16.msra.mxu0 %v1284_v49 }
 0x21f   :  { %821 = vmatprep.subr.bf16.mxu0 %v1289_v50 }
 0x222   :  { %822 = vmatpush1.bf16.msra.mxu0 %v1287_v51 }
 0x2b8   :  { %v327_v38 = vpop.f32.mrb[8].mxu0 }
 0x2b9   :  { %v328_v39 = vadd.f32 %v327_v38, %v243_v36  ;;  %v329_v40 = vpop.f32.mrb[9].mxu0 }
 0x2ba   :  { %v330_v41 = vadd.f32 %v329_v40, %v247_v37  ;;  %v331_v42 = vpop.f32.mrb[10].mxu0 }
 0x2bb   :  { %v334_v43 = vmax.f32 %v328_v39, 0.0  ;;  %v332_v44 = vpop.f32.mrb[11].mxu0 }
 0x2bc   :  { %v335_v45 = vmax.f32 %v330_v41, 0.0 }
 0x2bd   :  { %v336_v47 = vpack.c.bf16 %v334_v43, %v334_v43 }
 0x2be   :  { %v337_v46 = vpack.c.bf16 %v335_v45, %v335_v45 }
 0x2c0   :  { %574 = vmatprep.mubr.bf16.mxu1 %v337_v46 }
 0x2c1   :  { %575 = vmatmul.mubr.bf16.vlgmr.msra.gmra.mrb[0].mxu1 %v336_v47 }
 0x2c2   :  { %1128 = vmatpush3.bf16.msra.mxu1 %v1291_v53 }
 0x2c3   :  { %1129 = vmatprep.subr.bf16.mxu1 %v1292_v54 }
 0x2c6   :  { %1130 = vmatpush3.bf16.msra.mxu1 %v1293_v55 }
 0x2c7   :  { %1131 = vmatprep.subr.bf16.mxu1 %v1294_v56 }
 0x2ca   :  { %1132 = vmatpush3.bf16.msra.mxu1 %v1295_v57 }
 0x2cb   :  { %1133 = vmatprep.subr.bf16.mxu1 %v1296_v58 }
 0x2ce   :  { %1134 = vmatpush3.bf16.msra.mxu1 %v1297_v59 }
 0x2cf   :  { %1135 = vmatprep.subr.bf16.mxu1 %v1298_v60 }
 0x2d2   :  { %1136 = vmatpush3.bf16.msra.mxu1 %v1299_v61 }
 0x2d3   :  { %1137 = vmatprep.subr.bf16.mxu1 %v1300_v62 }
 0x2d6   :  { %1138 = vmatpush3.bf16.msra.mxu1 %v1301_v63 }
 0x2d7   :  { %1139 = vmatprep.subr.bf16.mxu1 %v1302_v13 }
 0x2da   :  { %1140 = vmatpush3.bf16.msra.mxu1 %v1303_v14 }
 0x2db   :  { %1141 = vmatprep.subr.bf16.mxu1 %v1304_v15 }
 0x2de   :  { %1142 = vmatpush3.bf16.msra.mxu1 %v1305_v16 }
 0x394   :  { %v576_v3 = vpop.f32.mrb[0].mxu1 }
 0x395   :  { %v577_v4 = vadd.f32 %v576_v3, %v375_v1  ;;  %v578_v5 = vpop.f32.mrb[1].mxu1 }
 0x396   :  { %v579_v6 = vadd.f32 %v578_v5, %v379_v2  ;;  %v580_v7 = vpop.f32.mrb[2].mxu1 }
 0x397   :  { %v583_v8 = vmax.f32 %v577_v4, 0.0  ;;  %v581_v9 = vpop.f32.mrb[3].mxu1 }
 0x398   :  { %v584_v10 = vmax.f32 %v579_v6, 0.0 }
 0x399   :  { %v585_v12 = vpack.c.bf16 %v583_v8, %v583_v8 }
 0x39a   :  { %v586_v11 = vpack.c.bf16 %v584_v10, %v584_v10 }
 0x39c   :  { %823 = vmatprep.mubr.bf16.mxu0 %v586_v11 }
 0x39d   :  { %824 = vmatmul.mubr.bf16.vlgmr.msra.gmra.mrb[12].mxu0 %v585_v12 }
 0x470   :  { %v825_v20 = vpop.f32.mrb[12].mxu0 }
 0x471   :  { %v826_v21 = vadd.f32 %v825_v20, %v624_v18  ;;  %v827_v22 = vpop.f32.mrb[13].mxu0 }
 0x472   :  { %v828_v23 = vadd.f32 %v827_v22, %v628_v19  ;;  %v829_v24 = vpop.f32.mrb[14].mxu0 }
 0x473   :  { %v832_v25 = vmax.f32 %v826_v21, 0.0  ;;  %v830_v26 = vpop.f32.mrb[15].mxu0 }
 0x474   :  { %v833_v27 = vmax.f32 %v828_v23, 0.0 }
 0x475   :  { %v834_v29 = vpack.c.bf16 %v832_v25, %v832_v25 }
 0x476   :  { %v835_v28 = vpack.c.bf16 %v833_v27, %v833_v27 }
 0x478   :  { %1003 = vmatprep.mubr.bf16.mxu1 %v835_v28 }
 0x479   :  { %1004 = vmatmul.mubr.bf16.vlgmr.msra.gmra.mrb[4].mxu1 %v834_v29 }
 0x54c   :  { %v1143_v30 = vpop.f32.mrb[4].mxu1 }
 0x54d   :  { %v1144_v32 = vpop.f32.mrb[5].mxu1 }
 0x54e   :  { %v1145_v34 = vadd.f32 %v1144_v32, %v1143_v30  ;;  %v1146_v36 = vpop.f32.mrb[6].mxu1 }
 0x54f   :  { %v1147_v33 = vpop.f32.mrb[7].mxu1 }
 0x550   :  { %v1006_v35 = vadd.f32 %v1145_v34, %v1102_v31 }
 0x552   :  { %1012 = vst.msk [vmem:[%s1596_s13] sm:$0xff] %vm1011_vm4, %v1006_v35 }
 0x553   :  { %1017 = vsyncpa [#allocation4], 1 }
 0x554   :  { %1018 = vsyncpa [#allocation6], 1 }

</bundles_post_ra>
